<compile_context>
chip_gen: v5e
topology: v5e:2x2
jax: 0.10.0
libtpu: 0.0.40
codegen_flags: <defaults>
</compile_context>

<pallas_src>
import functools

import jax
import jax.numpy as jnp
from jax import lax
from jax.experimental import pallas as pl
from jax.experimental.pallas import tpu as pltpu


DESC_DIM = 128        # SIFT descriptor dimensionality
_NUM_DMA_SLOTS = 8    # max in-flight row DMAs in the gather kernel (power of 2)
_NORM_EPS = 1e-12     # guard against all-zero rows (0/0 -> NaN)


def _round_up(x: int, m: int) -> int:
    return pl.cdiv(x, m) * m


def _normalize_rows(d, root_norm: bool):
    """Per-row RootSIFT (L1 + sqrt) or L2 normalization.  d: (rows, 128) f32."""
    if root_norm:
        norm = jnp.maximum(jnp.sum(jnp.abs(d), axis=-1, keepdims=True), _NORM_EPS)
        # sqrt(d / norm) == sqrt(d) * rsqrt(norm); rsqrt runs on the EUP slot.
        return jnp.sqrt(d) * lax.rsqrt(norm)
    ssq = jnp.maximum(jnp.sum(d * d, axis=-1, keepdims=True), _NORM_EPS)
    return d * lax.rsqrt(ssq)


# --------------------------------------------------------------------------
# Fused DMA row gather + normalize.
#   idx_ref  : SMEM (M_pad,) int32 — scalar-prefetched top-k indices
#   desc_hbm : HBM  (N, 128) f32   — full descriptor table, never copied whole
#   out_ref  : VMEM (block_m, 128) — output block for this grid step
#   buf      : VMEM (block_m, 128) f32 scratch the row DMAs land in
#   sems     : DMA semaphore array (_NUM_DMA_SLOTS,) bounding in-flight DMAs
# --------------------------------------------------------------------------
def _gather_normalize_kernel(idx_ref, desc_hbm, out_ref, buf, sems, *,
                             normalize: bool, root_norm: bool):
    block_m = out_ref.shape[0]
    n_rows = desc_hbm.shape[0]
    base = pl.program_id(0) * block_m

    def row_copy(local_row):
        # Clamp so a bad / padded index can never issue an OOB DMA.
        src = jnp.clip(idx_ref[base + local_row], 0, n_rows - 1)
        return pltpu.make_async_copy(
            desc_hbm.at[src],
            buf.at[local_row],
            sems.at[local_row & (_NUM_DMA_SLOTS - 1)])

    # Prime up to _NUM_DMA_SLOTS row DMAs (static small unrolled loop).
    for s in range(min(_NUM_DMA_SLOTS, block_m)):
        row_copy(s).start()

    # Wait row r, immediately refill its semaphore slot with row r + SLOTS.
    def body(r, carry):
        row_copy(r).wait()

        @pl.when(r + _NUM_DMA_SLOTS < block_m)
        def _():
            row_copy(r + _NUM_DMA_SLOTS).start()

        return carry

    lax.fori_loop(0, block_m, body, 0)

    d = buf[...]
    if normalize:
        d = _normalize_rows(d, root_norm)
    out_ref[...] = d.astype(out_ref.dtype)


def gather_normalize_descriptors(descriptors: jax.Array, idx: jax.Array, *,
                                 normalize: bool = True, root_norm: bool = True,
                                 block_rows: int = 512,
                                 out_dtype=jnp.float32) -> jax.Array:
    """Fused: out[m] = normalize(descriptors[idx[m]]).  descriptors: (N,128).

    Descriptors stay in HBM; only the selected rows are DMA'd.  No cap on N.
    """
    n, dim = descriptors.shape
    assert dim == DESC_DIM, f"expected {DESC_DIM}-d descriptors, got {dim}"
    m = idx.shape[0]
    if descriptors.dtype != jnp.float32:
        descriptors = descriptors.astype(jnp.float32)

    bm = min(_round_up(block_rows, 8), _round_up(m, 8))
    m_pad = _round_up(m, bm)
    idx = idx.astype(jnp.int32)
    if m_pad != m:
        # Padding indices with 0 keeps every DMA in bounds; padded rows are
        # sliced off below (tiny (pad,128) extra write only).
        idx = jnp.pad(idx, (0, m_pad - m))

    kernel = functools.partial(_gather_normalize_kernel,
                               normalize=normalize, root_norm=root_norm)
    out = pl.pallas_call(
        kernel,
        out_shape=jax.ShapeDtypeStruct((m_pad, DESC_DIM), out_dtype),
        grid_spec=pltpu.PrefetchScalarGridSpec(
            num_scalar_prefetch=1,
            grid=(m_pad // bm,),
            in_specs=[pl.BlockSpec(memory_space=pl.ANY)],       # table stays in HBM
            out_specs=pl.BlockSpec((bm, DESC_DIM), lambda i, idx_ref: (i, 0)),
            scratch_shapes=[pltpu.VMEM((bm, DESC_DIM), jnp.float32),
                            pltpu.SemaphoreType.DMA((_NUM_DMA_SLOTS,))]),
        compiler_params=pltpu.CompilerParams(
            dimension_semantics=("parallel",)),
    )(idx, descriptors)
    return out[:m] if m_pad != m else out


# --------------------------------------------------------------------------
# Standalone tiled normalization kernel (fallback for already-gathered data).
# Large row blocks (default 4096 rows = 2 MiB/tile), no pad/slice wrapper —
# the grid is pl.cdiv(n, br) and OOB writes of the ragged last block are
# masked.  Row axis is "parallel" so v7x shards it across both TensorCores.
# --------------------------------------------------------------------------
def _normalize_kernel(desc_ref, out_ref, *, root_norm: bool):
    out_ref[...] = _normalize_rows(desc_ref[...].astype(jnp.float32),
                                   root_norm).astype(out_ref.dtype)


def normalize_descriptors(descriptors: jax.Array, root_norm: bool = True,
                          block_rows: int = 4096,
                          out_dtype=jnp.float32) -> jax.Array:
    """Pallas-tiled descriptor normalization for arbitrary N. descriptors: (N,128)."""
    n, dim = descriptors.shape
    assert dim == DESC_DIM, f"expected {DESC_DIM}-d descriptors, got {dim}"
    if descriptors.dtype != jnp.float32:
        descriptors = descriptors.astype(jnp.float32)

    br = min(_round_up(block_rows, 8), _round_up(n, 8))
    kernel = functools.partial(_normalize_kernel, root_norm=root_norm)
    return pl.pallas_call(
        kernel,
        out_shape=jax.ShapeDtypeStruct((n, DESC_DIM), out_dtype),
        grid=(pl.cdiv(n, br),),
        in_specs=[pl.BlockSpec((br, DESC_DIM), lambda i: (i, 0))],
        out_specs=pl.BlockSpec((br, DESC_DIM), lambda i: (i, 0)),
        compiler_params=pltpu.CompilerParams(
            dimension_semantics=("parallel",)),
    )(descriptors)


# --------------------------------------------------------------------------
# SIFT.forward on pre-detected features.
# --------------------------------------------------------------------------
def sift_forward(keypoints: jax.Array, scores: jax.Array, descriptors: jax.Array,
                 *, max_keypoints: int, normalize_desc: bool = True,
                 root_norm: bool = True, out_dtype=jnp.float32):
    """Mirrors SIFT.forward on pre-detected features.

    keypoints:   (N, 2)   float32 (x, y)
    scores:      (N,)     float32 detector responses
    descriptors: (N, 128) float32 raw descriptors
    Returns (keypoints_topk, scores_topk, descriptors_topk[_normalized]).
    """
    # TODO(synk): radius-based NMS (KDTree.query_ball_point) and cv2 detection
    # are sequential, data-dependent host routines with no clean Pallas
    # equivalent — equivalent here to nms_radius == 0 (all keypoints kept).
    n = scores.shape[0]
    k = min(max_keypoints, n)

    # Top-`max_keypoints` by response (argpartition in the original; exact
    # membership matches, only ordering may differ — we use sorted top-k).
    _, top_idx = jax.lax.top_k(scores, k)
    kpts_sel = jnp.take(keypoints, top_idx, axis=0)
    scores_sel = jnp.take(scores, top_idx, axis=0)

    # Single fused path for any N: DMA row gather (+ optional normalize).
    desc_sel = gather_normalize_descriptors(
        descriptors, top_idx, normalize=normalize_desc,
        root_norm=root_norm, out_dtype=out_dtype)
    return kpts_sel, scores_sel, desc_sel


# --------------------------------------------------------------------------
# Pure-JAX reference of the normalization path (mirrors the numpy code).
# --------------------------------------------------------------------------
def _normalize_reference(desc, root_norm=True):
    desc = desc.astype(jnp.float32)
    if root_norm:
        norm = jnp.sum(jnp.abs(desc), axis=1, keepdims=True)
        return jnp.sqrt(desc / norm)
    norm = jnp.linalg.norm(desc, axis=1, keepdims=True)
    return desc / norm


if __name__ == "__main__":
    key = jax.random.PRNGKey(0)
    k_kpts, k_scores, k_desc = jax.random.split(key, 3)

    num_candidates = 256   # "detected" keypoints before top-k selection
    max_keypoints = 64

    # Synthetic detector outputs (true SIFT descriptors are non-negative).
    keypoints = jax.random.uniform(k_kpts, (num_candidates, 2),
                                   jnp.float32, 0.0, 640.0)
    scores = jax.random.uniform(k_scores, (num_candidates,), jnp.float32)
    descriptors = jax.random.uniform(k_desc, (num_candidates, DESC_DIM),
                                     jnp.float32, 0.0, 255.0)

    # Reference gather + normalizations.
    _, top_idx = jax.lax.top_k(scores, max_keypoints)
    desc_gathered = jnp.take(descriptors, top_idx, axis=0)
    ref_root = _normalize_reference(desc_gathered, root_norm=True)
    ref_l2 = _normalize_reference(desc_gathered, root_norm=False)

    # --- fused DMA-gather + RootSIFT normalize ---
    kpts_out, scores_out, desc_out = sift_forward(
        keypoints, scores, descriptors,
        max_keypoints=max_keypoints, normalize_desc=True, root_norm=True)
    jax.block_until_ready(desc_out)

    assert desc_out.shape == (max_keypoints, DESC_DIM)
    assert kpts_out.shape == (max_keypoints, 2)
    assert scores_out.shape == (max_keypoints,)
    assert jnp.allclose(kpts_out, jnp.take(keypoints, top_idx, axis=0))
    assert jnp.allclose(desc_out, ref_root, atol=1e-5, rtol=1e-5)

    # --- fused plain-L2 path ---
    _, _, desc_l2_fused = sift_forward(
        keypoints, scores, descriptors,
        max_keypoints=max_keypoints, normalize_desc=True, root_norm=False)
    jax.block_until_ready(desc_l2_fused)
    assert jnp.allclose(desc_l2_fused, ref_l2, atol=1e-5, rtol=1e-5)

    # --- gather only (normalize_desc=False) must match jnp.take exactly ---
    _, _, desc_raw = sift_forward(
        keypoints, scores, descriptors,
        max_keypoints=max_keypoints, normalize_desc=False)
    jax.block_until_ready(desc_raw)
    assert jnp.array_equal(desc_raw, desc_gathered)

    # --- non-block-multiple keypoint count exercises index padding + slice ---
    _, _, desc_50 = sift_forward(
        keypoints, scores, descriptors,
        max_keypoints=50, normalize_desc=True, root_norm=True)
    jax.block_until_ready(desc_50)
    _, top50 = jax.lax.top_k(scores, 50)
    ref_50 = _normalize_reference(jnp.take(descriptors, top50, axis=0),
                                  root_norm=True)
    assert desc_50.shape == (50, DESC_DIM)
    assert jnp.allclose(desc_50, ref_50, atol=1e-5, rtol=1e-5)

    # --- standalone tiled normalize kernel with a ragged (non-divisible) grid ---
    ref_root_all = _normalize_reference(descriptors, root_norm=True)
    ref_l2_all = _normalize_reference(descriptors, root_norm=False)
    desc_root_tiled = normalize_descriptors(descriptors, root_norm=True,
                                            block_rows=48)   # 256 = 5*48 + 16
    desc_l2_tiled = normalize_descriptors(descriptors, root_norm=False,
                                          block_rows=48)
    jax.block_until_ready(desc_l2_tiled)
    assert jnp.allclose(desc_root_tiled, ref_root_all, atol=1e-5, rtol=1e-5)
    assert jnp.allclose(desc_l2_tiled, ref_l2_all, atol=1e-5, rtol=1e-5)

    print("KERNEL_OK")
</pallas_src>

<mosaic_0001>
module attributes {stable_mosaic.version = 11 : i64} {
  func.func @_gather_normalize_kernel(%arg0: i32, %arg1: memref<64xi32, #tpu.memory_space<smem>>, %arg2: memref<256x128xf32, #tpu.memory_space<any>>, %arg3: memref<64x128xf32, #tpu.memory_space<vmem>>, %arg4: memref<64x128xf32, #tpu.memory_space<vmem>>, %arg5: memref<8x!tpu.dma_semaphore, #tpu.memory_space<semaphore_mem>>) attributes {dimension_semantics = [#tpu.dimension_semantics<parallel>], iteration_bounds = array<i64: 1>, scalar_prefetch = 1 : i64, scratch_operands = 2 : i64, tpu.core_type = #tpu.core_type<tc>, window_params = [{}, {transform_indices = @transform_1, window_bounds = array<i64: 64, 128>}]} {
    %c64_i32 = arith.constant 64 : i32
    %0 = arith.muli %arg0, %c64_i32 : i32
    %c0_i32 = arith.constant 0 : i32
    %1 = arith.addi %0, %c0_i32 : i32
    %2 = arith.index_cast %1 : i32 to index
    %3 = memref.load %arg1[%2] : memref<64xi32, #tpu.memory_space<smem>>
    %c0_i32_0 = arith.constant 0 : i32
    %c255_i32 = arith.constant 255 : i32
    %4 = arith.maxsi %c0_i32_0, %3 : i32
    %5 = arith.minsi %c255_i32, %4 : i32
    %c0_i32_1 = arith.constant 0 : i32
    %c0_i32_2 = arith.constant 0 : i32
    %c0_i32_3 = arith.constant 0 : i32
    %6 = tpu.memref_slice %arg2[%5, %c0_i32_3] : memref<256x128xf32, #tpu.memory_space<any>> -> memref<1x128xf32, #tpu.memory_space<any>>
    %7 = tpu.memref_squeeze %6 : memref<1x128xf32, #tpu.memory_space<any>> -> memref<128xf32, #tpu.memory_space<any>>
    %c0_i32_4 = arith.constant 0 : i32
    %8 = tpu.memref_slice %arg4[%c0_i32_1, %c0_i32_4] : memref<64x128xf32, #tpu.memory_space<vmem>> -> memref<1x128xf32, #tpu.memory_space<vmem>>
    %9 = tpu.memref_squeeze %8 : memref<1x128xf32, #tpu.memory_space<vmem>> -> memref<128xf32, #tpu.memory_space<vmem>>
    %10 = tpu.memref_slice %arg5[%c0_i32_2] : memref<8x!tpu.dma_semaphore, #tpu.memory_space<semaphore_mem>> -> memref<1x!tpu.dma_semaphore, #tpu.memory_space<semaphore_mem>>
    %11 = tpu.memref_squeeze %10 : memref<1x!tpu.dma_semaphore, #tpu.memory_space<semaphore_mem>> -> memref<!tpu.dma_semaphore, #tpu.memory_space<semaphore_mem>>
    tpu.enqueue_dma source(%7 : memref<128xf32, #tpu.memory_space<any>>) target(%9 : memref<128xf32, #tpu.memory_space<vmem>>) target_semaphore(%11 : memref<!tpu.dma_semaphore, #tpu.memory_space<semaphore_mem>>)
    %c1_i32 = arith.constant 1 : i32
    %12 = arith.addi %0, %c1_i32 : i32
    %13 = arith.index_cast %12 : i32 to index
    %14 = memref.load %arg1[%13] : memref<64xi32, #tpu.memory_space<smem>>
    %c0_i32_5 = arith.constant 0 : i32
    %c255_i32_6 = arith.constant 255 : i32
    %15 = arith.maxsi %c0_i32_5, %14 : i32
    %16 = arith.minsi %c255_i32_6, %15 : i32
    %c1_i32_7 = arith.constant 1 : i32
    %c1_i32_8 = arith.constant 1 : i32
    %c0_i32_9 = arith.constant 0 : i32
    %17 = tpu.memref_slice %arg2[%16, %c0_i32_9] : memref<256x128xf32, #tpu.memory_space<any>> -> memref<1x128xf32, #tpu.memory_space<any>>
    %18 = tpu.memref_squeeze %17 : memref<1x128xf32, #tpu.memory_space<any>> -> memref<128xf32, #tpu.memory_space<any>>
    %c0_i32_10 = arith.constant 0 : i32
    %19 = tpu.memref_slice %arg4[%c1_i32_7, %c0_i32_10] : memref<64x128xf32, #tpu.memory_space<vmem>> -> memref<1x128xf32, #tpu.memory_space<vmem>>
    %20 = tpu.memref_squeeze %19 : memref<1x128xf32, #tpu.memory_space<vmem>> -> memref<128xf32, #tpu.memory_space<vmem>>
    %21 = tpu.memref_slice %arg5[%c1_i32_8] : memref<8x!tpu.dma_semaphore, #tpu.memory_space<semaphore_mem>> -> memref<1x!tpu.dma_semaphore, #tpu.memory_space<semaphore_mem>>
    %22 = tpu.memref_squeeze %21 : memref<1x!tpu.dma_semaphore, #tpu.memory_space<semaphore_mem>> -> memref<!tpu.dma_semaphore, #tpu.memory_space<semaphore_mem>>
    tpu.enqueue_dma source(%18 : memref<128xf32, #tpu.memory_space<any>>) target(%20 : memref<128xf32, #tpu.memory_space<vmem>>) target_semaphore(%22 : memref<!tpu.dma_semaphore, #tpu.memory_space<semaphore_mem>>)
    %c2_i32 = arith.constant 2 : i32
    %23 = arith.addi %0, %c2_i32 : i32
    %24 = arith.index_cast %23 : i32 to index
    %25 = memref.load %arg1[%24] : memref<64xi32, #tpu.memory_space<smem>>
    %c0_i32_11 = arith.constant 0 : i32
    %c255_i32_12 = arith.constant 255 : i32
    %26 = arith.maxsi %c0_i32_11, %25 : i32
    %27 = arith.minsi %c255_i32_12, %26 : i32
    %c2_i32_13 = arith.constant 2 : i32
    %c2_i32_14 = arith.constant 2 : i32
    %c0_i32_15 = arith.constant 0 : i32
    %28 = tpu.memref_slice %arg2[%27, %c0_i32_15] : memref<256x128xf32, #tpu.memory_space<any>> -> memref<1x128xf32, #tpu.memory_space<any>>
    %29 = tpu.memref_squeeze %28 : memref<1x128xf32, #tpu.memory_space<any>> -> memref<128xf32, #tpu.memory_space<any>>
    %c0_i32_16 = arith.constant 0 : i32
    %30 = tpu.memref_slice %arg4[%c2_i32_13, %c0_i32_16] : memref<64x128xf32, #tpu.memory_space<vmem>> -> memref<1x128xf32, #tpu.memory_space<vmem>>
    %31 = tpu.memref_squeeze %30 : memref<1x128xf32, #tpu.memory_space<vmem>> -> memref<128xf32, #tpu.memory_space<vmem>>
    %32 = tpu.memref_slice %arg5[%c2_i32_14] : memref<8x!tpu.dma_semaphore, #tpu.memory_space<semaphore_mem>> -> memref<1x!tpu.dma_semaphore, #tpu.memory_space<semaphore_mem>>
    %33 = tpu.memref_squeeze %32 : memref<1x!tpu.dma_semaphore, #tpu.memory_space<semaphore_mem>> -> memref<!tpu.dma_semaphore, #tpu.memory_space<semaphore_mem>>
    tpu.enqueue_dma source(%29 : memref<128xf32, #tpu.memory_space<any>>) target(%31 : memref<128xf32, #tpu.memory_space<vmem>>) target_semaphore(%33 : memref<!tpu.dma_semaphore, #tpu.memory_space<semaphore_mem>>)
    %c3_i32 = arith.constant 3 : i32
    %34 = arith.addi %0, %c3_i32 : i32
    %35 = arith.index_cast %34 : i32 to index
    %36 = memref.load %arg1[%35] : memref<64xi32, #tpu.memory_space<smem>>
    %c0_i32_17 = arith.constant 0 : i32
    %c255_i32_18 = arith.constant 255 : i32
    %37 = arith.maxsi %c0_i32_17, %36 : i32
    %38 = arith.minsi %c255_i32_18, %37 : i32
    %c3_i32_19 = arith.constant 3 : i32
    %c3_i32_20 = arith.constant 3 : i32
    %c0_i32_21 = arith.constant 0 : i32
    %39 = tpu.memref_slice %arg2[%38, %c0_i32_21] : memref<256x128xf32, #tpu.memory_space<any>> -> memref<1x128xf32, #tpu.memory_space<any>>
    %40 = tpu.memref_squeeze %39 : memref<1x128xf32, #tpu.memory_space<any>> -> memref<128xf32, #tpu.memory_space<any>>
    %c0_i32_22 = arith.constant 0 : i32
    %41 = tpu.memref_slice %arg4[%c3_i32_19, %c0_i32_22] : memref<64x128xf32, #tpu.memory_space<vmem>> -> memref<1x128xf32, #tpu.memory_space<vmem>>
    %42 = tpu.memref_squeeze %41 : memref<1x128xf32, #tpu.memory_space<vmem>> -> memref<128xf32, #tpu.memory_space<vmem>>
    %43 = tpu.memref_slice %arg5[%c3_i32_20] : memref<8x!tpu.dma_semaphore, #tpu.memory_space<semaphore_mem>> -> memref<1x!tpu.dma_semaphore, #tpu.memory_space<semaphore_mem>>
    %44 = tpu.memref_squeeze %43 : memref<1x!tpu.dma_semaphore, #tpu.memory_space<semaphore_mem>> -> memref<!tpu.dma_semaphore, #tpu.memory_space<semaphore_mem>>
    tpu.enqueue_dma source(%40 : memref<128xf32, #tpu.memory_space<any>>) target(%42 : memref<128xf32, #tpu.memory_space<vmem>>) target_semaphore(%44 : memref<!tpu.dma_semaphore, #tpu.memory_space<semaphore_mem>>)
    %c4_i32 = arith.constant 4 : i32
    %45 = arith.addi %0, %c4_i32 : i32
    %46 = arith.index_cast %45 : i32 to index
    %47 = memref.load %arg1[%46] : memref<64xi32, #tpu.memory_space<smem>>
    %c0_i32_23 = arith.constant 0 : i32
    %c255_i32_24 = arith.constant 255 : i32
    %48 = arith.maxsi %c0_i32_23, %47 : i32
    %49 = arith.minsi %c255_i32_24, %48 : i32
    %c4_i32_25 = arith.constant 4 : i32
    %c4_i32_26 = arith.constant 4 : i32
    %c0_i32_27 = arith.constant 0 : i32
    %50 = tpu.memref_slice %arg2[%49, %c0_i32_27] : memref<256x128xf32, #tpu.memory_space<any>> -> memref<1x128xf32, #tpu.memory_space<any>>
    %51 = tpu.memref_squeeze %50 : memref<1x128xf32, #tpu.memory_space<any>> -> memref<128xf32, #tpu.memory_space<any>>
    %c0_i32_28 = arith.constant 0 : i32
    %52 = tpu.memref_slice %arg4[%c4_i32_25, %c0_i32_28] : memref<64x128xf32, #tpu.memory_space<vmem>> -> memref<1x128xf32, #tpu.memory_space<vmem>>
    %53 = tpu.memref_squeeze %52 : memref<1x128xf32, #tpu.memory_space<vmem>> -> memref<128xf32, #tpu.memory_space<vmem>>
    %54 = tpu.memref_slice %arg5[%c4_i32_26] : memref<8x!tpu.dma_semaphore, #tpu.memory_space<semaphore_mem>> -> memref<1x!tpu.dma_semaphore, #tpu.memory_space<semaphore_mem>>
    %55 = tpu.memref_squeeze %54 : memref<1x!tpu.dma_semaphore, #tpu.memory_space<semaphore_mem>> -> memref<!tpu.dma_semaphore, #tpu.memory_space<semaphore_mem>>
    tpu.enqueue_dma source(%51 : memref<128xf32, #tpu.memory_space<any>>) target(%53 : memref<128xf32, #tpu.memory_space<vmem>>) target_semaphore(%55 : memref<!tpu.dma_semaphore, #tpu.memory_space<semaphore_mem>>)
    %c5_i32 = arith.constant 5 : i32
    %56 = arith.addi %0, %c5_i32 : i32
    %57 = arith.index_cast %56 : i32 to index
    %58 = memref.load %arg1[%57] : memref<64xi32, #tpu.memory_space<smem>>
    %c0_i32_29 = arith.constant 0 : i32
    %c255_i32_30 = arith.constant 255 : i32
    %59 = arith.maxsi %c0_i32_29, %58 : i32
    %60 = arith.minsi %c255_i32_30, %59 : i32
    %c5_i32_31 = arith.constant 5 : i32
    %c5_i32_32 = arith.constant 5 : i32
    %c0_i32_33 = arith.constant 0 : i32
    %61 = tpu.memref_slice %arg2[%60, %c0_i32_33] : memref<256x128xf32, #tpu.memory_space<any>> -> memref<1x128xf32, #tpu.memory_space<any>>
    %62 = tpu.memref_squeeze %61 : memref<1x128xf32, #tpu.memory_space<any>> -> memref<128xf32, #tpu.memory_space<any>>
    %c0_i32_34 = arith.constant 0 : i32
    %63 = tpu.memref_slice %arg4[%c5_i32_31, %c0_i32_34] : memref<64x128xf32, #tpu.memory_space<vmem>> -> memref<1x128xf32, #tpu.memory_space<vmem>>
    %64 = tpu.memref_squeeze %63 : memref<1x128xf32, #tpu.memory_space<vmem>> -> memref<128xf32, #tpu.memory_space<vmem>>
    %65 = tpu.memref_slice %arg5[%c5_i32_32] : memref<8x!tpu.dma_semaphore, #tpu.memory_space<semaphore_mem>> -> memref<1x!tpu.dma_semaphore, #tpu.memory_space<semaphore_mem>>
    %66 = tpu.memref_squeeze %65 : memref<1x!tpu.dma_semaphore, #tpu.memory_space<semaphore_mem>> -> memref<!tpu.dma_semaphore, #tpu.memory_space<semaphore_mem>>
    tpu.enqueue_dma source(%62 : memref<128xf32, #tpu.memory_space<any>>) target(%64 : memref<128xf32, #tpu.memory_space<vmem>>) target_semaphore(%66 : memref<!tpu.dma_semaphore, #tpu.memory_space<semaphore_mem>>)
    %c6_i32 = arith.constant 6 : i32
    %67 = arith.addi %0, %c6_i32 : i32
    %68 = arith.index_cast %67 : i32 to index
    %69 = memref.load %arg1[%68] : memref<64xi32, #tpu.memory_space<smem>>
    %c0_i32_35 = arith.constant 0 : i32
    %c255_i32_36 = arith.constant 255 : i32
    %70 = arith.maxsi %c0_i32_35, %69 : i32
    %71 = arith.minsi %c255_i32_36, %70 : i32
    %c6_i32_37 = arith.constant 6 : i32
    %c6_i32_38 = arith.constant 6 : i32
    %c0_i32_39 = arith.constant 0 : i32
    %72 = tpu.memref_slice %arg2[%71, %c0_i32_39] : memref<256x128xf32, #tpu.memory_space<any>> -> memref<1x128xf32, #tpu.memory_space<any>>
    %73 = tpu.memref_squeeze %72 : memref<1x128xf32, #tpu.memory_space<any>> -> memref<128xf32, #tpu.memory_space<any>>
    %c0_i32_40 = arith.constant 0 : i32
    %74 = tpu.memref_slice %arg4[%c6_i32_37, %c0_i32_40] : memref<64x128xf32, #tpu.memory_space<vmem>> -> memref<1x128xf32, #tpu.memory_space<vmem>>
    %75 = tpu.memref_squeeze %74 : memref<1x128xf32, #tpu.memory_space<vmem>> -> memref<128xf32, #tpu.memory_space<vmem>>
    %76 = tpu.memref_slice %arg5[%c6_i32_38] : memref<8x!tpu.dma_semaphore, #tpu.memory_space<semaphore_mem>> -> memref<1x!tpu.dma_semaphore, #tpu.memory_space<semaphore_mem>>
    %77 = tpu.memref_squeeze %76 : memref<1x!tpu.dma_semaphore, #tpu.memory_space<semaphore_mem>> -> memref<!tpu.dma_semaphore, #tpu.memory_space<semaphore_mem>>
    tpu.enqueue_dma source(%73 : memref<128xf32, #tpu.memory_space<any>>) target(%75 : memref<128xf32, #tpu.memory_space<vmem>>) target_semaphore(%77 : memref<!tpu.dma_semaphore, #tpu.memory_space<semaphore_mem>>)
    %c7_i32 = arith.constant 7 : i32
    %78 = arith.addi %0, %c7_i32 : i32
    %79 = arith.index_cast %78 : i32 to index
    %80 = memref.load %arg1[%79] : memref<64xi32, #tpu.memory_space<smem>>
    %c0_i32_41 = arith.constant 0 : i32
    %c255_i32_42 = arith.constant 255 : i32
    %81 = arith.maxsi %c0_i32_41, %80 : i32
    %82 = arith.minsi %c255_i32_42, %81 : i32
    %c7_i32_43 = arith.constant 7 : i32
    %c7_i32_44 = arith.constant 7 : i32
    %c0_i32_45 = arith.constant 0 : i32
    %83 = tpu.memref_slice %arg2[%82, %c0_i32_45] : memref<256x128xf32, #tpu.memory_space<any>> -> memref<1x128xf32, #tpu.memory_space<any>>
    %84 = tpu.memref_squeeze %83 : memref<1x128xf32, #tpu.memory_space<any>> -> memref<128xf32, #tpu.memory_space<any>>
    %c0_i32_46 = arith.constant 0 : i32
    %85 = tpu.memref_slice %arg4[%c7_i32_43, %c0_i32_46] : memref<64x128xf32, #tpu.memory_space<vmem>> -> memref<1x128xf32, #tpu.memory_space<vmem>>
    %86 = tpu.memref_squeeze %85 : memref<1x128xf32, #tpu.memory_space<vmem>> -> memref<128xf32, #tpu.memory_space<vmem>>
    %87 = tpu.memref_slice %arg5[%c7_i32_44] : memref<8x!tpu.dma_semaphore, #tpu.memory_space<semaphore_mem>> -> memref<1x!tpu.dma_semaphore, #tpu.memory_space<semaphore_mem>>
    %88 = tpu.memref_squeeze %87 : memref<1x!tpu.dma_semaphore, #tpu.memory_space<semaphore_mem>> -> memref<!tpu.dma_semaphore, #tpu.memory_space<semaphore_mem>>
    tpu.enqueue_dma source(%84 : memref<128xf32, #tpu.memory_space<any>>) target(%86 : memref<128xf32, #tpu.memory_space<vmem>>) target_semaphore(%88 : memref<!tpu.dma_semaphore, #tpu.memory_space<semaphore_mem>>)
    %c0_i32_47 = arith.constant 0 : i32
    %c64_i32_48 = arith.constant 64 : i32
    %89 = arith.addi %c0_i32_47, %c64_i32_48 : i32
    %c1_i32_49 = arith.constant 1 : i32
    scf.for %arg6 = %c0_i32_47 to %89 step %c1_i32_49  : i32 {
      %101 = arith.addi %0, %arg6 : i32
      %102 = arith.index_cast %101 : i32 to index
      %103 = memref.load %arg1[%102] : memref<64xi32, #tpu.memory_space<smem>>
      %c0_i32_55 = arith.constant 0 : i32
      %c255_i32_56 = arith.constant 255 : i32
      %104 = arith.maxsi %c0_i32_55, %103 : i32
      %105 = arith.minsi %c255_i32_56, %104 : i32
      %c7_i32_57 = arith.constant 7 : i32
      %106 = arith.andi %arg6, %c7_i32_57 : i32
      %c0_i32_58 = arith.constant 0 : i32
      %107 = tpu.memref_slice %arg2[%105, %c0_i32_58] : memref<256x128xf32, #tpu.memory_space<any>> -> memref<1x128xf32, #tpu.memory_space<any>>
      %108 = tpu.memref_squeeze %107 : memref<1x128xf32, #tpu.memory_space<any>> -> memref<128xf32, #tpu.memory_space<any>>
      %c0_i32_59 = arith.constant 0 : i32
      %109 = tpu.memref_slice %arg4[%arg6, %c0_i32_59] : memref<64x128xf32, #tpu.memory_space<vmem>> -> memref<1x128xf32, #tpu.memory_space<vmem>>
      %110 = tpu.memref_squeeze %109 : memref<1x128xf32, #tpu.memory_space<vmem>> -> memref<128xf32, #tpu.memory_space<vmem>>
      %111 = tpu.memref_slice %arg5[%106] : memref<8x!tpu.dma_semaphore, #tpu.memory_space<semaphore_mem>> -> memref<1x!tpu.dma_semaphore, #tpu.memory_space<semaphore_mem>>
      %112 = tpu.memref_squeeze %111 : memref<1x!tpu.dma_semaphore, #tpu.memory_space<semaphore_mem>> -> memref<!tpu.dma_semaphore, #tpu.memory_space<semaphore_mem>>
      tpu.wait_dma2 semaphore(%112 : memref<!tpu.dma_semaphore, #tpu.memory_space<semaphore_mem>>) src(%108 : memref<128xf32, #tpu.memory_space<any>>) dst(%110 : memref<128xf32, #tpu.memory_space<vmem>>)
      %c8_i32 = arith.constant 8 : i32
      %113 = arith.addi %arg6, %c8_i32 : i32
      %c64_i32_60 = arith.constant 64 : i32
      %114 = arith.cmpi slt, %113, %c64_i32_60 : i32
      %115 = arith.extui %114 : i1 to i32
      %c0_i32_61 = arith.constant 0 : i32
      %116 = arith.cmpi ne, %115, %c0_i32_61 : i32
      scf.if %116 {
        %c8_i32_62 = arith.constant 8 : i32
        %117 = arith.addi %arg6, %c8_i32_62 : i32
        %118 = arith.addi %0, %117 : i32
        %119 = arith.index_cast %118 : i32 to index
        %120 = memref.load %arg1[%119] : memref<64xi32, #tpu.memory_space<smem>>
        %c0_i32_63 = arith.constant 0 : i32
        %c255_i32_64 = arith.constant 255 : i32
        %121 = arith.maxsi %c0_i32_63, %120 : i32
        %122 = arith.minsi %c255_i32_64, %121 : i32
        %c7_i32_65 = arith.constant 7 : i32
        %123 = arith.andi %117, %c7_i32_65 : i32
        %c0_i32_66 = arith.constant 0 : i32
        %124 = tpu.memref_slice %arg2[%122, %c0_i32_66] : memref<256x128xf32, #tpu.memory_space<any>> -> memref<1x128xf32, #tpu.memory_space<any>>
        %125 = tpu.memref_squeeze %124 : memref<1x128xf32, #tpu.memory_space<any>> -> memref<128xf32, #tpu.memory_space<any>>
        %c0_i32_67 = arith.constant 0 : i32
        %126 = tpu.memref_slice %arg4[%117, %c0_i32_67] : memref<64x128xf32, #tpu.memory_space<vmem>> -> memref<1x128xf32, #tpu.memory_space<vmem>>
        %127 = tpu.memref_squeeze %126 : memref<1x128xf32, #tpu.memory_space<vmem>> -> memref<128xf32, #tpu.memory_space<vmem>>
        %128 = tpu.memref_slice %arg5[%123] : memref<8x!tpu.dma_semaphore, #tpu.memory_space<semaphore_mem>> -> memref<1x!tpu.dma_semaphore, #tpu.memory_space<semaphore_mem>>
        %129 = tpu.memref_squeeze %128 : memref<1x!tpu.dma_semaphore, #tpu.memory_space<semaphore_mem>> -> memref<!tpu.dma_semaphore, #tpu.memory_space<semaphore_mem>>
        tpu.enqueue_dma source(%125 : memref<128xf32, #tpu.memory_space<any>>) target(%127 : memref<128xf32, #tpu.memory_space<vmem>>) target_semaphore(%129 : memref<!tpu.dma_semaphore, #tpu.memory_space<semaphore_mem>>)
      } else {
      }
    }
    %c64_i32_50 = arith.constant 64 : i32
    %c0 = arith.constant 0 : index
    %c0_51 = arith.constant 0 : index
    %90 = vector.load %arg4[%c0, %c0_51] : memref<64x128xf32, #tpu.memory_space<vmem>>, vector<64x128xf32>
    %91 = math.absf %90 : vector<64x128xf32>
    %cst = arith.constant dense<0.000000e+00> : vector<64xf32>
    %92 = vector.multi_reduction <add>, %91, %cst [1] : vector<64x128xf32> to vector<64xf32>
    %93 = vector.shape_cast %92 : vector<64xf32> to vector<64x1xf32>
    %cst_52 = arith.constant 9.99999996E-13 : f32
    %94 = vector.broadcast %cst_52 : f32 to vector<64x1xf32>
    %95 = arith.maximumf %93, %94 : vector<64x1xf32>
    %96 = math.sqrt %90 : vector<64x128xf32>
    %97 = math.rsqrt %95 : vector<64x1xf32>
    %98 = vector.broadcast %97 : vector<64x1xf32> to vector<64x128xf32>
    %99 = arith.mulf %96, %98 : vector<64x128xf32>
    %c0_53 = arith.constant 0 : index
    %c0_54 = arith.constant 0 : index
    %100 = vector.load %arg3[%c0_53, %c0_54] : memref<64x128xf32, #tpu.memory_space<vmem>>, vector<64x128xf32>
    tpu.vector_store %arg3[%c0_53, %c0_54], %99 {strides = array<i32>} : memref<64x128xf32, #tpu.memory_space<vmem>>, vector<64x128xf32>,
    return
  }
  func.func @transform_1(%arg0: i32, %arg1: memref<64xi32, #tpu.memory_space<smem>>) -> (i32, i32) {
    %c0_i32 = arith.constant 0 : i32
    %c0_i32_0 = arith.constant 0 : i32
    return %arg0, %c0_i32 : i32, i32
  }
}

</mosaic_0001>

<bundles_post_ra>
// kernel: tpu_custom_call.1
= control target key start
LH: loop header
LB: loop body
LE: loop exit
PB: predicated region body
PF: predicated region fallthrough
CT: control target
= control target key end

     0   :  { %s959_s12 = smov [#allocation5]   ;;  %s1315_s0 = inlined_call_operand.hbm [shape: s32[64], index: 0, kind: input, shape index: {}]   ;;  %s1316_s1 = inlined_call_operand.hbm [shape: f32[256,128], index: 1, kind: input, shape index: {}]   ;;  %s1317_s2 = inlined_call_operand.hbm [shape: f32[64,128], index: 2, kind: output, shape index: {}]  }
   0x1   :  { %s8_s11 = sshll.u32 %s1315_s0, 4  ;;  %s9_s11 = int_to_ptr.hbm [resolvable:$true] %s8_s11 }
   0x2   :  { %11 = dma.hbm_to_smem %s9_s11, 16, %s959_s12, [#allocation4] }
   0x3   :  { %949 = dma.done.wait [#allocation4], 16 }
   0x4   :  { %950 = vsyncadd [#allocation4], 4294967280 }
   0x5   :  { %14 = sfence }
   0x6   :  { %15 = vsyncpa [#allocation7], 0  ;;  %s17_s13 = sld [smem:[#allocation5]]  ;;  %s960_s14 = smov [#allocation2]  }
   0x7   :  { %s990_s15 = sshll.u32 %s960_s14, 4  ;;  %s558_s16 = sld [smem:[#allocation5 + $0x1]]  ;;  %s33_s15 = int_to_ptr.vmem [resolvable:$true] %s990_s15 }
   0x8   :  { %s961_s17 = smov [#allocation2 + $0x1]   ;;  %s995_s19 = sld [smem:[#allocation5 + $0x2]] }
   0x9   :  { %s993_s18 = sshll.u32 %s961_s17, 4  ;;  %s962_s0 = smov [#allocation2 + $0x2]   ;;  %s55_s18 = int_to_ptr.vmem [resolvable:$true] %s993_s18 }
   0xa   :  { %s998_s20 = sshll.u32 %s962_s0, 4  ;;  %s1000_s21 = sld [smem:[#allocation5 + $0x3]]  ;;  %s77_s20 = int_to_ptr.vmem [resolvable:$true] %s998_s20 }
   0xb   :  { %s1012_s6 = scalar_lea.hbm %s1316_s1, 256 }
   0xc   :  { %p18_p0 = scmp.gt.s32.totalorder %s17_s13, 0  ;;  %p553_p1 = scmp.lt.s32.totalorder %s17_s13, 255 }
   0xd   :  { %p38_p2 = scmp.gt.s32.totalorder %s558_s16, 0  ;;  %p559_p3 = scmp.lt.s32.totalorder %s558_s16, 255 }
   0xe   :  { %s1319_s13 = smov (!%p18_p0, %s17_s13), 0  ;;  %p60_p4 = scmp.gt.s32.totalorder %s995_s19, 0 }
   0xf   :  { %s1321_s16 = smov (!%p38_p2, %s558_s16), 0  ;;  %s1323_s13 = smov (!%p553_p1, %s1319_s13), 255 }
  0x10   :  { %s1325_s16 = smov (!%p559_p3, %s1321_s16), 255  ;;  %s22_s24 = scalar_lea.hbm %s1316_s1, %s1323_s13 }
  0x11   :  { %s30_s25 = sshll.u32 %s22_s24, 4  ;;  %s42_s28 = scalar_lea.hbm %s1316_s1, %s1325_s16  ;;  %s31_s25 = int_to_ptr.hbm [resolvable:$true] %s30_s25 }
  0x12   :  { %s52_s29 = sshll.u32 %s42_s28, 4  ;;  %s701_s30 = sshra.s32 %s31_s25, 4  ;;  %s702_s30 = int_to_ptr.hbm [resolvable:$true] %s701_s30  ;;  %s53_s29 = int_to_ptr.hbm [resolvable:$true] %s52_s29 }
  0x13   :  { %s703_s3 = scalar_lea.hbm %s702_s30, 1  ;;  %p706_p6 = scmp.lt.s32.totalorder %s702_s30, %s1316_s1 }
  0x14   :  { %p704_p5 = scmp.ne.s32.totalorder %s702_s30, %s703_s3  ;;  %p707_p7 = scmp.lt.s32.totalorder %s1012_s6, %s703_s3 }
  0x16   :  { %p708_p8 = por %p707_p7, %p706_p6 }
  0x18   :  { %p709_p9 = pnand %p708_p8, %p704_p5 }
  0x1a   :  { %712 = shalt.err (!%p709_p9)  }
  0x1b   :  { %35 = dma.hbm_to_vmem [thread:$0]  %s31_s25, 16, %s33_s15, [#allocation3] }
  0x1c   :  { %p565_p10 = scmp.lt.s32.totalorder %s995_s19, 255  ;;  %s725_s9 = sshra.s32 %s53_s29, 4  ;;  %s726_s9 = int_to_ptr.hbm [resolvable:$true] %s725_s9 }
  0x1d   :  { %s727_s10 = scalar_lea.hbm %s726_s9, 1  ;;  %p730_p12 = scmp.lt.s32.totalorder %s726_s9, %s1316_s1 }
  0x1e   :  { %p728_p11 = scmp.ne.s32.totalorder %s726_s9, %s727_s10  ;;  %p731_p13 = scmp.lt.s32.totalorder %s1012_s6, %s727_s10 }
  0x20   :  { %p732_p0 = por %p731_p13, %p730_p12 }
  0x22   :  { %p733_p1 = pnand %p732_p0, %p728_p11 }
  0x24   :  { %736 = shalt.err (!%p733_p1)  }
  0x25   :  { %57 = dma.hbm_to_vmem [thread:$0]  %s53_s29, 16, %s55_s18, [#allocation3 + $0x1] }
  0x26   :  { %s61_s13 = scalar_select %p60_p4, %s995_s19, 0 }
  0x27   :  { %p82_p2 = scmp.gt.s32.totalorder %s1000_s21, 0  ;;  %p571_p3 = scmp.lt.s32.totalorder %s1000_s21, 255 }
  0x28   :  { %s1327_s13 = smov (!%p565_p10, %s61_s13), 255  ;;  %s963_s22 = smov [#allocation2 + $0x3]  }
  0x29   :  { %s83_s14 = scalar_select %p82_p2, %s1000_s21, 0 }
  0x2a   :  { %s64_s17 = scalar_lea.hbm %s1316_s1, %s1327_s13  ;;  %s1039_s23 = sshll.u32 %s963_s22, 4  ;;  %s99_s23 = int_to_ptr.vmem [resolvable:$true] %s1039_s23 }
  0x2b   :  { %s74_s0 = sshll.u32 %s64_s17, 4  ;;  %s75_s0 = int_to_ptr.hbm [resolvable:$true] %s74_s0 }
  0x2c   :  { %s749_s24 = sshra.s32 %s75_s0, 4  ;;  %s750_s24 = int_to_ptr.hbm [resolvable:$true] %s749_s24 }
  0x2d   :  { %s751_s18 = scalar_lea.hbm %s750_s24, 1  ;;  %p754_p5 = scmp.lt.s32.totalorder %s750_s24, %s1316_s1 }
  0x2e   :  { %p752_p4 = scmp.ne.s32.totalorder %s750_s24, %s751_s18  ;;  %p755_p6 = scmp.lt.s32.totalorder %s1012_s6, %s751_s18 }
  0x30   :  { %p756_p7 = por %p755_p6, %p754_p5 }
  0x32   :  { %p757_p8 = pnand %p756_p7, %p752_p4 }
  0x34   :  { %760 = shalt.err (!%p757_p8)  }
  0x35   :  { %79 = dma.hbm_to_vmem [thread:$0]  %s75_s0, 16, %s77_s20, [#allocation3 + $0x2] }
  0x36   :  { %s1329_s14 = smov (!%p571_p3, %s83_s14), 255  ;;  %s576_s19 = sld [smem:[#allocation5 + $0x4]] }
  0x37   :  { %s86_s29 = scalar_lea.hbm %s1316_s1, %s1329_s14  ;;  %s964_s3 = smov [#allocation2 + $0x4]  }
  0x38   :  { %s96_s30 = sshll.u32 %s86_s29, 4  ;;  %s1051_s4 = sshll.u32 %s964_s3, 4  ;;  %s97_s30 = int_to_ptr.hbm [resolvable:$true] %s96_s30  ;;  %s121_s4 = int_to_ptr.vmem [resolvable:$true] %s1051_s4 }
  0x39   :  { %s773_s5 = sshra.s32 %s97_s30, 4  ;;  %s774_s5 = int_to_ptr.hbm [resolvable:$true] %s773_s5 }
  0x3a   :  { %s775_s20 = scalar_lea.hbm %s774_s5, 1  ;;  %p778_p10 = scmp.lt.s32.totalorder %s774_s5, %s1316_s1 }
  0x3b   :  { %p776_p9 = scmp.ne.s32.totalorder %s774_s5, %s775_s20  ;;  %p779_p11 = scmp.lt.s32.totalorder %s1012_s6, %s775_s20 }
  0x3d   :  { %p780_p12 = por %p779_p11, %p778_p10 }
  0x3f   :  { %p781_p13 = pnand %p780_p12, %p776_p9 }
  0x41   :  { %784 = shalt.err (!%p781_p13)  }
  0x42   :  { %101 = dma.hbm_to_vmem [thread:$0]  %s97_s30, 16, %s99_s23, [#allocation3 + $0x3] }
  0x43   :  { %s1058_s8 = sld [smem:[#allocation5 + $0x5]]  ;;  %p104_p0 = scmp.gt.s32.totalorder %s576_s19, 0 }
  0x44   :  { %p577_p1 = scmp.lt.s32.totalorder %s576_s19, 255  ;;  %s965_s9 = smov [#allocation2 + $0x5]  }
  0x45   :  { %s1060_s10 = sshll.u32 %s965_s9, 4  ;;  %s588_s11 = sld [smem:[#allocation5 + $0x6]]  ;;  %s143_s10 = int_to_ptr.vmem [resolvable:$true] %s1060_s10 }
  0x46   :  { %s1331_s19 = smov (!%p104_p0, %s576_s19), 0  ;;  %s966_s15 = smov [#allocation2 + $0x6]  }
  0x47   :  { %s1333_s19 = smov (!%p577_p1, %s1331_s19), 255  ;;  %s1068_s16 = sshll.u32 %s966_s15, 4  ;;  %s165_s16 = int_to_ptr.vmem [resolvable:$true] %s1068_s16 }
  0x48   :  { %s108_s14 = scalar_lea.hbm %s1316_s1, %s1333_s19 }
  0x49   :  { %p126_p2 = scmp.gt.s32.totalorder %s1058_s8, 0  ;;  %p583_p3 = scmp.lt.s32.totalorder %s1058_s8, 255 }
  0x4a   :  { %s118_s17 = sshll.u32 %s108_s14, 4  ;;  %s119_s17 = int_to_ptr.hbm [resolvable:$true] %s118_s17 }
  0x4b   :  { %p148_p4 = scmp.gt.s32.totalorder %s588_s11, 0  ;;  %p589_p5 = scmp.lt.s32.totalorder %s588_s11, 255 }
  0x4c   :  { %s797_s0 = sshra.s32 %s119_s17, 4  ;;  %s798_s0 = int_to_ptr.hbm [resolvable:$true] %s797_s0 }
  0x4d   :  { %s799_s22 = scalar_lea.hbm %s798_s0, 1  ;;  %p802_p7 = scmp.lt.s32.totalorder %s798_s0, %s1316_s1 }
  0x4e   :  { %p800_p6 = scmp.ne.s32.totalorder %s798_s0, %s799_s22  ;;  %p803_p8 = scmp.lt.s32.totalorder %s1012_s6, %s799_s22 }
  0x50   :  { %p804_p9 = por %p803_p8, %p802_p7 }
  0x52   :  { %p805_p10 = pnand %p804_p9, %p800_p6 }
  0x54   :  { %808 = shalt.err (!%p805_p10)  }
  0x55   :  { %123 = dma.hbm_to_vmem [thread:$0]  %s119_s17, 16, %s121_s4, [#allocation3 + $0x4] }
  0x56   :  { %s127_s18 = scalar_select %p126_p2, %s1058_s8, 0 }
  0x57   :  { %s149_s25 = scalar_select %p148_p4, %s588_s11, 0 }
  0x58   :  { %s1335_s18 = smov (!%p583_p3, %s127_s18), 255 }
  0x59   :  { %s1337_s25 = smov (!%p589_p5, %s149_s25), 255  ;;  %s130_s27 = scalar_lea.hbm %s1316_s1, %s1335_s18 }
  0x5a   :  { %s140_s28 = sshll.u32 %s130_s27, 4  ;;  %s152_s3 = scalar_lea.hbm %s1316_s1, %s1337_s25  ;;  %s141_s28 = int_to_ptr.hbm [resolvable:$true] %s140_s28 }
  0x5b   :  { %s162_s4 = sshll.u32 %s152_s3, 4  ;;  %s821_s5 = sshra.s32 %s141_s28, 4  ;;  %s822_s5 = int_to_ptr.hbm [resolvable:$true] %s821_s5  ;;  %s163_s4 = int_to_ptr.hbm [resolvable:$true] %s162_s4 }
  0x5c   :  { %s823_s20 = scalar_lea.hbm %s822_s5, 1  ;;  %p826_p12 = scmp.lt.s32.totalorder %s822_s5, %s1316_s1 }
  0x5d   :  { %p824_p11 = scmp.ne.s32.totalorder %s822_s5, %s823_s20  ;;  %p827_p13 = scmp.lt.s32.totalorder %s1012_s6, %s823_s20 }
  0x5f   :  { %p828_p0 = por %p827_p13, %p826_p12 }
  0x61   :  { %p829_p1 = pnand %p828_p0, %p824_p11 }
  0x63   :  { %832 = shalt.err (!%p829_p1)  }
  0x64   :  { %145 = dma.hbm_to_vmem [thread:$0]  %s141_s28, 16, %s143_s10, [#allocation3 + $0x5] }
  0x65   :  { %s594_s8 = sld [smem:[#allocation5 + $0x7]]  ;;  %s845_s9 = sshra.s32 %s163_s4, 4  ;;  %s846_s9 = int_to_ptr.hbm [resolvable:$true] %s845_s9 }
  0x66   :  { %s847_s11 = scalar_lea.hbm %s846_s9, 1  ;;  %p850_p3 = scmp.lt.s32.totalorder %s846_s9, %s1316_s1 }
  0x67   :  { %p848_p2 = scmp.ne.s32.totalorder %s846_s9, %s847_s11  ;;  %p851_p4 = scmp.lt.s32.totalorder %s1012_s6, %s847_s11 }
  0x69   :  { %p852_p5 = por %p851_p4, %p850_p3 }
  0x6b   :  { %p853_p6 = pnand %p852_p5, %p848_p2 }
  0x6d   :  { %856 = shalt.err (!%p853_p6)  }
  0x6e   :  { %167 = dma.hbm_to_vmem [thread:$0]  %s163_s4, 16, %s165_s16, [#allocation3 + $0x6] }
  0x6f   :  { %p170_p7 = scmp.gt.s32.totalorder %s594_s8, 0  ;;  %p595_p8 = scmp.lt.s32.totalorder %s594_s8, 255 }
  0x70   :  { %s967_s10 = smov [#allocation2 + $0x7]  }
  0x71   :  { %s1339_s8 = smov (!%p170_p7, %s594_s8), 0  ;;  %s186_s14 = sshll.u32 %s967_s10, 4  ;;  %s187_s14 = int_to_ptr.vmem [resolvable:$true] %s186_s14 }
  0x72   :  { %s1341_s8 = smov (!%p595_p8, %s1339_s8), 255 }
  0x73   :  { %s174_s0 = scalar_lea.hbm %s1316_s1, %s1341_s8 }
  0x74   :  { %s184_s22 = sshll.u32 %s174_s0, 4  ;;  %s185_s22 = int_to_ptr.hbm [resolvable:$true] %s184_s22 }
  0x75   :  { %s869_s23 = sshra.s32 %s185_s22, 4  ;;  %s870_s23 = int_to_ptr.hbm [resolvable:$true] %s869_s23 }
  0x76   :  { %s871_s24 = scalar_lea.hbm %s870_s23, 1  ;;  %p874_p10 = scmp.lt.s32.totalorder %s870_s23, %s1316_s1 }
  0x77   :  { %p872_p9 = scmp.ne.s32.totalorder %s870_s23, %s871_s24  ;;  %p875_p11 = scmp.lt.s32.totalorder %s1012_s6, %s871_s24 }
  0x79   :  { %p876_p12 = por %p875_p11, %p874_p10 }
  0x7b   :  { %p877_p13 = pnand %p876_p12, %p872_p9 }
  0x7d   :  { %880 = shalt.err (!%p877_p13)  }
  0x7e   :  { %189 = dma.hbm_to_vmem [thread:$0]  %s185_s22, 16, %s187_s14, [#allocation3 + $0x7] }
  0x7f   :  { %s1107_s25 = smov 0  }
  0x80 LB: > { %s198_s26 = sand.u32 7, %s957_s25  ;;  %s957_s25 = sphi %s1107_s25, %s195_s25  }
  0x81   : > { %s199_s19 = scalar_lea.sflag [#allocation3], %s198_s26 }
  0x82   : > { %951 = dma.done.wait %s199_s19, 16 }
  0x83   : > { %952 = vsyncadd %s199_s19, 4294967280  ;;  %s1114_s27 = sadd.s32 8, %s957_s25  ;;  %s545_s3 = scalar_lea.vmem [#allocation2], %s957_s25 }
  0x84   : > { %p636_p0 = scmp.lt.s32.totalorder %s1114_s27, 64  ;;  %s546_s4 = scalar_lea.vmem %s545_s3, 8 [#allocation2] }
  0x85   : > { %s213_s5 = sand.u32 7, %s1114_s27  ;;  %s226_s20 = sshll.u32 %s546_s4, 4  ;;  %s1127_s20 = int_to_ptr.vmem [resolvable:$true] %s226_s20 }
  0x86   : > { %s633_s28 = scalar_select %p636_p0, [#allocation5], [#allocation28] }
  0x87   : > { %s634_s29 = scalar_select %p636_p0, %s1114_s27, 0 }
  0x88   : > { %s216_s11 = scalar_lea.sflag [#allocation3], %s213_s5 }
  0x89   : > { %s208_s30 = sld [smem:[%s633_s28 + %s634_s29]] }
  0x8f   : > { %p209_p1 = scmp.gt.s32.totalorder %s208_s30, 0  ;;  %p601_p2 = scmp.lt.s32.totalorder %s208_s30, 255 }
  0x91   : > { %s1343_s30 = smov (!%p209_p1, %s208_s30), 0 }
  0x92   : > { %s1345_s30 = smov (!%p601_p2, %s1343_s30), 255 }
  0x93   : > { %s214_s8 = scalar_lea.hbm %s1316_s1, %s1345_s30 }
  0x94   : > { %s1129_s9 = sshll.u32 %s214_s8, 4  ;;  %s225_s9 = int_to_ptr.hbm [resolvable:$true] %s1129_s9 }
  0x95   : > { %s893_s12 = sshra.s32 %s225_s9, 4  ;;  %s894_s12 = int_to_ptr.hbm [resolvable:$true] %s893_s12 }
  0x96   : > { %s895_s13 = scalar_lea.hbm %s894_s12, 1  ;;  %p900_p6 = scmp.lt.s32.totalorder %s894_s12, %s1316_s1 }
  0x97   : > { %p896_p3 = scmp.ne.s32.totalorder %s894_s12, %s895_s13  ;;  %p901_p7 = scmp.lt.s32.totalorder %s1012_s6, %s895_s13 }
  0x99   : > { %p897_p4 = pnand %p896_p3, %p636_p0  ;;  %p902_p8 = por %p901_p7, %p900_p6 }
  0x9b   : > { %p898_p5 = pneg %p897_p4 }
  0x9d   : > { %p903_p9 = pnand %p902_p8, %p898_p5 }
  0x9f   : > { %906 = shalt.err (!%p903_p9)  }
  0xa0   : > { %s907_s15 = sshra.s32 %s1127_s20, 4  ;;  %s968_s0 = smov [#allocation2]   ;;  %s908_s15 = int_to_ptr.vmem [resolvable:$true] %s907_s15 }
  0xa1   : > { %s909_s17 = scalar_lea.vmem %s908_s15, 1  ;;  %s913_s22 = scalar_lea.vmem %s968_s0, 64 }
  0xa2   : > { %p910_p10 = scmp.ne.s32.totalorder %s908_s15, %s909_s17  ;;  %p914_p13 = scmp.lt.s32.totalorder %s908_s15, [#allocation2] }
  0xa3   : > { %p915_p1 = scmp.lt.s32.totalorder %s913_s22, %s909_s17 }
  0xa4   : > { %p911_p11 = pnand %p910_p10, %p636_p0 }
  0xa5   : > { %p916_p2 = por %p915_p1, %p914_p13 }
  0xa6   : > { %p912_p12 = pneg %p911_p11 }
  0xa8   : > { %p917_p3 = pnand %p916_p2, %p912_p12 }
  0xaa   : > { %920 = shalt.err (!%p917_p3)  }
  0xab   : > { %635 = dma.hbm_to_vmem [thread:$0]  (%p636_p0), %s225_s9, 16, %s1127_s20, %s216_s11 }
  0xac   : > { %s195_s25 = sadd.s32 1, %s957_s25  }
  0xad   : > { %p192_p4 = scmp.ge.s32.totalorder %s195_s25, 64  }
  0xae   :  { %v1147_v0 = vld [vmem:[#allocation2 + $0x20] sm:$0xff] (%p192_p4)  ;;  %v1149_v1 = vld [vmem:[#allocation2 + $0x10] sm:$0xff] (%p192_p4)  ;;  %v1156_v6 = vld [vmem:[#allocation2 + $0x28] sm:$0xff] (%p192_p4)  ;;  %s969_s1 = smov (%p192_p4), [#allocation6]   ;;  %s468_s18 = sshll.u32 (%p192_p4), %s1317_s2, 4  ;;  %s469_s18 = int_to_ptr.hbm [resolvable:$true] %s468_s18 }
  0xaf   :  { %194 = sbr.rel (!%p192_p4) target bundleno = 128 (0x80), region = 100  ;;  %v1151_v2 = vld [vmem:[#allocation2] sm:$0xff] (%p192_p4)  ;;  %v242_v3 = vand.u32 (%p192_p4), 2147483647, %v1147_v0  ;;  %v240_v4 = vand.u32 (%p192_p4), 2147483647, %v1149_v1  ;;  %657 = vrsqrt.f32 (%p192_p4), %v1147_v0 }
  0xb0   :  { %v238_v5 = vand.u32 (%p192_p4), 2147483647, %v1151_v2  ;;  %v1158_v7 = vld [vmem:[#allocation2 + $0x18] sm:$0xff] (%p192_p4)  ;;  %v1160_v8 = vld [vmem:[#allocation2 + $0x8] sm:$0xff] (%p192_p4)  ;;  %v243_v9 = vand.u32 (%p192_p4), 2147483647, %v1156_v6  ;;  %659 = vrsqrt.f32 (%p192_p4), %v1149_v1 }
  0xb1   :  { %254 = vadd.xlane.f32.xlu2 (%p192_p4), %v242_v3  ;;  %250 = vadd.xlane.f32.xlu1 (%p192_p4), %v240_v4  ;;  %v241_v10 = vand.u32 (%p192_p4), 2147483647, %v1158_v7  ;;  %v239_v11 = vand.u32 (%p192_p4), 2147483647, %v1160_v8  ;;  %v1165_v12 = vld [vmem:[#allocation2 + $0x38] sm:$0xff] (%p192_p4)  ;;  %v1167_v13 = vld [vmem:[#allocation2 + $0x30] sm:$0xff] (%p192_p4)  ;;  %661 = vrsqrt.f32 (%p192_p4), %v1151_v2 }
  0xb2   :  { %246 = vadd.xlane.f32.xlu0 (%p192_p4), %v238_v5  ;;  %v245_v14 = vand.u32 (%p192_p4), 2147483647, %v1165_v12  ;;  %v244_v15 = vand.u32 (%p192_p4), 2147483647, %v1167_v13  ;;  %663 = vrsqrt.f32 (%p192_p4), %v1156_v6  ;;  %vm325_vm0 = vcmp.eq.f32.partialorder (%p192_p4), %v1147_v0, inf  ;;  %s466_s6 = sshll.u32 (%p192_p4), %s969_s1, 4  ;;  %s467_s6 = int_to_ptr.vmem [resolvable:$true] %s466_s6 }
  0xb3   :  { %665 = vrsqrt.f32 (%p192_p4), %v1158_v7  ;;  %v328_v48 = vand.u32 (%p192_p4), 2147483648, %v1147_v0  ;;  %vm327_vm1 = vcmp.eq.f32.partialorder (%p192_p4), %v1147_v0, 0.0  ;;  %vm301_vm2 = vcmp.eq.f32.partialorder (%p192_p4), %v1149_v1, inf  ;;  %s970_s16 = smov (%p192_p4), 128   ;;  %s971_s25 = smov (%p192_p4), 8  }
  0xb4   :  { %667 = vrsqrt.f32 %v1160_v8  ;;  %vm277_vm3 = vcmp.eq.f32.partialorder %v1151_v2, inf  ;;  %v304_v4 = vand.u32 2147483648, %v1149_v1  ;;  %v280_v5 = vand.u32 2147483648, %v1151_v2 }
  0xb5   :  { %v658_v16 = vpop.eup %657  ;;  %669 = vrsqrt.f32 %v1165_v12  ;;  %vm303_vm4 = vcmp.eq.f32.partialorder %v1149_v1, 0.0  ;;  %vm279_vm5 = vcmp.eq.f32.partialorder %v1151_v2, 0.0  ;;  %vm337_vm6 = vcmp.eq.f32.partialorder %v1156_v6, inf }
  0xb6   :  { %v319_v17 = vmul.f32 %v658_v16, %v1147_v0  ;;  %v660_v18 = vpop.eup %659  ;;  %671 = vrsqrt.f32 %v1167_v13  ;;  %vm339_vm7 = vcmp.eq.f32.partialorder %v1156_v6, 0.0  ;;  %vm313_vm8 = vcmp.eq.f32.partialorder %v1158_v7, inf }
  0xb7   :  { %v662_v19 = vpop.eup %661  ;;  %v295_v21 = vmul.f32 %v660_v18, %v1149_v1  ;;  %vm315_vm9 = vcmp.eq.f32.partialorder %v1158_v7, 0.0  ;;  %vm289_vm10 = vcmp.eq.f32.partialorder %v1160_v8, inf  ;;  %vm291_vm11 = vcmp.eq.f32.partialorder %v1160_v8, 0.0 }
  0xb8   :  { %v320_v20 = vmul.f32 %v658_v16, %v319_v17  ;;  %v271_v22 = vmul.f32 %v662_v19, %v1151_v2  ;;  %v664_v23 = vpop.eup %663 }
  0xb9   :  { %256 = vadd.xlane.f32.xlu2 %v243_v9  ;;  %252 = vadd.xlane.f32.xlu1 %v241_v10  ;;  %v666_v24 = vpop.eup %665  ;;  %v296_v27 = vmul.f32 %v660_v18, %v295_v21  ;;  %v331_v29 = vmul.f32 %v664_v23, %v1156_v6 }
  0xba   :  { %248 = vadd.xlane.f32.xlu0 %v239_v11  ;;  %v321_v25 = vmul.f32 0.5, %v320_v20  ;;  %v668_v26 = vpop.eup %667  ;;  %v272_v28 = vmul.f32 %v662_v19, %v271_v22  ;;  %v307_v30 = vmul.f32 %v666_v24, %v1158_v7  ;;  %v316_v20 = vand.u32 2147483648, %v1158_v7 }
  0xbb   :  { %v283_v32 = vmul.f32 %v668_v26, %v1160_v8  ;;  %v297_v33 = vmul.f32 0.5, %v296_v27  ;;  %v332_v35 = vmul.f32 %v664_v23, %v331_v29  ;;  %v1188_v50 = vpop.eup %669 }
  0xbc   :  { %v322_v31 = vsub.f32 1.5, %v321_v25  ;;  %v273_v34 = vmul.f32 0.5, %v272_v28  ;;  %v308_v36 = vmul.f32 %v666_v24, %v307_v30  ;;  %v1207_v3 = vpop.eup %671  ;;  %v292_v30 = vand.u32 2147483648, %v1160_v8 }
  0xbd   :  { %v284_v38 = vmul.f32 %v668_v26, %v283_v32  ;;  %v298_v39 = vsub.f32 1.5, %v297_v33  ;;  %v333_v41 = vmul.f32 0.5, %v332_v35 }
  0xbe   :  { %v323_v37 = vmul.f32 %v658_v16, %v322_v31  ;;  %v274_v40 = vsub.f32 1.5, %v273_v34  ;;  %v309_v42 = vmul.f32 0.5, %v308_v36 }
  0xbf   :  { %v285_v44 = vmul.f32 0.5, %v284_v38  ;;  %v299_v45 = vmul.f32 %v660_v18, %v298_v39  ;;  %v334_v47 = vsub.f32 1.5, %v333_v41  ;;  %v343_v18 = vmul.f32 %v1207_v3, %v1167_v13 }
  0xc0   :  { %v324_v43 = vmul.f32 %v323_v37, %v1147_v0  ;;  %v275_v46 = vmul.f32 %v662_v19, %v274_v40  ;;  %v310_v49 = vsub.f32 1.5, %v309_v42 }
  0xc1   :  { %260 = vadd.xlane.f32.xlu1 %v245_v14  ;;  %v286_v54 = vsub.f32 1.5, %v285_v44  ;;  %v300_v56 = vmul.f32 %v299_v45, %v1149_v1  ;;  %v335_v61 = vmul.f32 %v664_v23, %v334_v47  ;;  %v344_v45 = vmul.f32 %v1207_v3, %v343_v18 }
  0xc2   :  { %258 = vadd.xlane.f32.xlu0 %v244_v15  ;;  %v326_v51 = vsel %vm325_vm0, %v1147_v0, %v324_v43  ;;  %v276_v58 = vmul.f32 %v275_v46, %v1151_v2  ;;  %v311_v63 = vmul.f32 %v666_v24, %v310_v49  ;;  %v355_v0 = vmul.f32 %v1188_v50, %v1165_v12 }
  0xc3   :  { %v1202_v62 = vsel %vm327_vm1, %v328_v48, %v326_v51  ;;  %v287_v9 = vmul.f32 %v668_v26, %v286_v54  ;;  %v302_v10 = vsel %vm301_vm2, %v1149_v1, %v300_v56  ;;  %v336_v14 = vmul.f32 %v335_v61, %v1156_v6 }
  0xc4   :  { %v278_v11 = vsel %vm277_vm3, %v1151_v2, %v276_v58  ;;  %v340_v15 = vand.u32 2147483648, %v1156_v6  ;;  %v312_v16 = vmul.f32 %v311_v63, %v1158_v7  ;;  %v356_v17 = vmul.f32 %v1188_v50, %v355_v0 }
  0xc5   :  { %v288_v22 = vmul.f32 %v287_v9, %v1160_v8  ;;  %v338_v29 = vsel %vm337_vm6, %v1156_v6, %v336_v14  ;;  %v305_v39 = vsel %vm303_vm4, %v304_v4, %v302_v10  ;;  %v281_v41 = vsel %vm279_vm5, %v280_v5, %v278_v11 }
  0xc6   :  { %v314_v34 = vsel %vm313_vm8, %v1158_v7, %v312_v16  ;;  %v357_v35 = vmul.f32 0.5, %v356_v17  ;;  %v1259_v44 = vsel %vm339_vm7, %v340_v15, %v338_v29 }
  0xc7   :  { %v290_v38 = vsel %vm289_vm10, %v1160_v8, %v288_v22  ;;  %v1264_v47 = vsel %vm315_vm9, %v316_v20, %v314_v34 }
  0xc8   :  { %v1268_v1 = vsel %vm291_vm11, %v292_v30, %v290_v38  ;;  %v358_v2 = vsub.f32 1.5, %v357_v35  ;;  %vm361_vm11 = vcmp.eq.f32.partialorder %v1165_v12, inf }
 0x124   :  { %v255_v52 = vpop.xlane.xlu2 %254  ;;  %v251_v53 = vpop.xlane.xlu1 %250 }
 0x125   :  { %v1192_v55 = vmax.f32 %v255_v52, 1e-12  ;;  %v1195_v57 = vmax.f32 %v251_v53, 1e-12  ;;  %v247_v59 = vpop.xlane.xlu0 %246 }
 0x126   :  { %v1200_v60 = vmax.f32 %v247_v59, 1e-12 }
 0x127   :  { %673 = vrsqrt.f32 %v1192_v55  ;;  %vm412_vm12 = vweird.f32 %v1192_v55  ;;  %vm392_vm14 = vweird.f32 %v1195_v57 }
 0x128   :  { %675 = vrsqrt.f32 %v1195_v57  ;;  %vm372_vm2 = vweird.f32 %v1200_v60 }
 0x129   :  { %677 = vrsqrt.f32 %v1200_v60 }
 0x12c   :  { %v257_v19 = vpop.xlane.xlu2 %256  ;;  %v253_v21 = vpop.xlane.xlu1 %252 }
 0x12d   :  { %v674_v23 = vpop.eup %673  ;;  %v1229_v24 = vmax.f32 %v257_v19, 1e-12  ;;  %v1231_v25 = vmax.f32 %v253_v21, 1e-12  ;;  %v249_v26 = vpop.xlane.xlu0 %248  ;;  %v359_v19 = vmul.f32 %v1188_v50, %v358_v2 }
 0x12e   :  { %v676_v27 = vpop.eup %675  ;;  %v407_v28 = vmul.f32 %v674_v23, %v1192_v55  ;;  %v1240_v31 = vmax.f32 %v249_v26, 1e-12  ;;  %vm413_vm13 = vweird.f32 %v674_v23 }
 0x12f   :  { %v678_v32 = vpop.eup %677  ;;  %v387_v33 = vmul.f32 %v676_v27, %v1195_v57  ;;  %679 = vrsqrt.f32 %v1229_v24  ;;  %vm393_vm15 = vweird.f32 %v676_v27  ;;  %vm414_vm1 = vmor %vm412_vm12, %vm413_vm13  ;;  %vm422_vm5 = vweird.f32 %v1229_v24 }
 0x130   :  { %v408_v36 = vmul.f32 %v674_v23, %v407_v28  ;;  %v367_v37 = vmul.f32 %v678_v32, %v1200_v60  ;;  %681 = vrsqrt.f32 %v1231_v25  ;;  %vm373_vm0 = vweird.f32 %v678_v32  ;;  %vm394_vm3 = vmor %vm392_vm14, %vm393_vm15 }
 0x131   :  { %v388_v40 = vmul.f32 %v676_v27, %v387_v33  ;;  %683 = vrsqrt.f32 %v1240_v31  ;;  %vm374_vm4 = vmor %vm372_vm2, %vm373_vm0  ;;  %v345_v60 = vmul.f32 0.5, %v344_v45  ;;  %vm402_vm10 = vweird.f32 %v1231_v25 }
 0x132   :  { %v409_v42 = vmul.f32 0.5, %v408_v36  ;;  %v368_v43 = vmul.f32 %v678_v32, %v367_v37  ;;  %vm382_vm13 = vweird.f32 %v1240_v31  ;;  %vm363_vm15 = vcmp.eq.f32.partialorder %v1165_v12, 0.0 }
 0x133   :  { %v389_v46 = vmul.f32 0.5, %v388_v40  ;;  %v346_v26 = vsub.f32 1.5, %v345_v60 }
 0x134   :  { %v410_v48 = vsub.f32 1.5, %v409_v42  ;;  %v369_v49 = vmul.f32 0.5, %v368_v43  ;;  %v261_v6 = vpop.xlane.xlu1 %260 }
 0x135   :  { %v680_v51 = vpop.eup %679  ;;  %v390_v52 = vsub.f32 1.5, %v389_v46  ;;  %v1272_v53 = vmax.f32 %v261_v6, 1e-12  ;;  %v259_v9 = vpop.xlane.xlu0 %258  ;;  %v347_v36 = vmul.f32 %v1207_v3, %v346_v26 }
 0x136   :  { %v682_v7 = vpop.eup %681  ;;  %v411_v54 = vmul.f32 %v674_v23, %v410_v48  ;;  %v370_v56 = vsub.f32 1.5, %v369_v49  ;;  %v417_v8 = vmul.f32 %v680_v51, %v1229_v24  ;;  %v1286_v20 = vmax.f32 %v259_v9, 1e-12 }
 0x137   :  { %v684_v58 = vpop.eup %683  ;;  %v391_v59 = vmul.f32 %v676_v27, %v390_v52  ;;  %v397_v61 = vmul.f32 %v682_v7, %v1231_v25  ;;  %685 = vrsqrt.f32 %v1272_v53  ;;  %vm423_vm6 = vweird.f32 %v680_v51 }
 0x138   :  { %v415_v63 = vsel %vm414_vm1, %v674_v23, %v411_v54  ;;  %v371_v0 = vmul.f32 %v678_v32, %v370_v56  ;;  %v418_v4 = vmul.f32 %v680_v51, %v417_v8  ;;  %v377_v5 = vmul.f32 %v684_v58, %v1240_v31  ;;  %vm424_vm9 = vmor %vm422_vm5, %vm423_vm6 }
 0x139   :  { %v450_v10 = vmul.f32 %v415_v63, %v1202_v62  ;;  %v395_v55 = vsel %vm394_vm3, %v676_v27, %v391_v59  ;;  %v398_v11 = vmul.f32 %v682_v7, %v397_v61  ;;  %vm403_vm7 = vweird.f32 %v682_v7 }
 0x13a   :  { %v448_v14 = vmul.f32 %v395_v55, %v305_v39  ;;  %v375_v15 = vsel %vm374_vm4, %v678_v32, %v371_v0  ;;  %v419_v16 = vmul.f32 0.5, %v418_v4  ;;  %v378_v17 = vmul.f32 %v684_v58, %v377_v5  ;;  %vm404_vm12 = vmor %vm402_vm10, %vm403_vm7 }
 0x13b   :  { %458 = vst [vmem:[#allocation6 + $0x20] sm:$0xff] %v450_v10  ;;  %v446_v18 = vmul.f32 %v375_v15, %v281_v41  ;;  %v399_v57 = vmul.f32 0.5, %v398_v11  ;;  %687 = vrsqrt.f32 %v1286_v20  ;;  %vm383_vm8 = vweird.f32 %v684_v58 }
 0x13c   :  { %456 = vst [vmem:[#allocation6 + $0x10] sm:$0xff] %v448_v14  ;;  %v420_v21 = vsub.f32 1.5, %v419_v16  ;;  %v379_v62 = vmul.f32 0.5, %v378_v17  ;;  %v360_v24 = vmul.f32 %v359_v19, %v1165_v12  ;;  %vm384_vm14 = vmor %vm382_vm13, %vm383_vm8  ;;  %v364_v25 = vand.u32 2147483648, %v1165_v12 }
 0x13d   :  { %v686_v22 = vpop.eup %685  ;;  %454 = vst [vmem:[#allocation6] sm:$0xff] %v446_v18  ;;  %v400_v23 = vsub.f32 1.5, %v399_v57  ;;  %v348_v43 = vmul.f32 %v347_v36, %v1167_v13  ;;  %vm349_vm1 = vcmp.eq.f32.partialorder %v1167_v13, inf  ;;  %vm442_vm2 = vweird.f32 %v1272_v53 }
 0x13e   :  { %v421_v27 = vmul.f32 %v680_v51, %v420_v21  ;;  %v380_v28 = vsub.f32 1.5, %v379_v62  ;;  %v437_v50 = vmul.f32 %v686_v22, %v1272_v53  ;;  %v362_v31 = vsel %vm361_vm11, %v1165_v12, %v360_v24 }
 0x13f   :  { %v401_v29 = vmul.f32 %v682_v7, %v400_v23  ;;  %vm443_vm0 = vweird.f32 %v686_v22  ;;  %v350_v48 = vsel %vm349_vm1, %v1167_v13, %v348_v43  ;;  %vm351_vm4 = vcmp.eq.f32.partialorder %v1167_v13, 0.0 }
 0x140   :  { %v425_v30 = vsel %vm424_vm9, %v680_v51, %v421_v27  ;;  %v381_v32 = vmul.f32 %v684_v58, %v380_v28  ;;  %v438_v33 = vmul.f32 %v686_v22, %v437_v50  ;;  %vm444_vm3 = vmor %vm442_vm2, %vm443_vm0  ;;  %vm432_vm6 = vweird.f32 %v1286_v20 }
 0x141   :  { %v451_v34 = vmul.f32 %v425_v30, %v1259_v44  ;;  %v405_v35 = vsel %vm404_vm12, %v682_v7, %v401_v29  ;;  %v688_v40 = vpop.eup %687  ;;  %v365_v44 = vsel %vm363_vm15, %v364_v25, %v362_v31 }
 0x142   :  { %v449_v37 = vmul.f32 %v405_v35, %v1264_v47  ;;  %v385_v38 = vsel %vm384_vm14, %v684_v58, %v381_v32  ;;  %v439_v39 = vmul.f32 0.5, %v438_v33  ;;  %v427_v3 = vmul.f32 %v688_v40, %v1286_v20 }
 0x143   :  { %459 = vst [vmem:[#allocation6 + $0x28] sm:$0xff] %v451_v34  ;;  %v447_v41 = vmul.f32 %v385_v38, %v1268_v1  ;;  %v352_v1 = vand.u32 2147483648, %v1167_v13  ;;  %vm433_vm5 = vweird.f32 %v688_v40 }
 0x144   :  { %457 = vst [vmem:[#allocation6 + $0x18] sm:$0xff] %v449_v37  ;;  %v440_v42 = vsub.f32 1.5, %v439_v39  ;;  %v428_v46 = vmul.f32 %v688_v40, %v427_v3  ;;  %vm434_vm7 = vmor %vm432_vm6, %vm433_vm5 }
 0x145   :  { %455 = vst [vmem:[#allocation6 + $0x8] sm:$0xff] %v447_v41  ;;  %v353_v6 = vsel %vm351_vm4, %v352_v1, %v350_v48 }
 0x146   :  { %v441_v45 = vmul.f32 %v686_v22, %v440_v42  ;;  %v429_v12 = vmul.f32 0.5, %v428_v46 }
 0x148   :  { %v445_v47 = vsel %vm444_vm3, %v686_v22, %v441_v45  ;;  %v430_v49 = vsub.f32 1.5, %v429_v12 }
 0x149   :  { %v453_v2 = vmul.f32 %v445_v47, %v365_v44 }
 0x14a   :  { %v431_v51 = vmul.f32 %v688_v40, %v430_v49 }
 0x14b   :  { %461 = vst [vmem:[#allocation6 + $0x38] sm:$0xff] %v453_v2 }
 0x14c   :  { %v435_v52 = vsel %vm434_vm7, %v688_v40, %v431_v51 }
 0x14d   :  { %v452_v53 = vmul.f32 %v435_v52, %v353_v6 }
 0x14f   :  { %460 = vst [vmem:[#allocation6 + $0x30] sm:$0xff] %v452_v53 }
 0x150   :  { %474 = dma.vmem_to_hbm [thread:$0]  %s467_s6, 1024, %s469_s18, [#allocation7], %s970_s16, %s970_s16, %s971_s25  }
 0x151   :  { %953 = dma.done.wait [#allocation7], 1024  }
 0x152   :  { %954 = vsyncadd [#allocation7], 4294966272 }
 0x153   :  { %479 = vsyncpa [#allocation7], 1 }
 0x154   :  { %480 = vsyncmov [#allocation3] }
 0x157   :  { %s481_s26 = vpop.sfrf %480 }
 0x158   :  { %p606_p0 = scmp.ne.s32.totalorder %s481_s26, 0 }
 0x15a   :  { %485 = shalt.err (%p606_p0)  }
 0x15b   :  { %487 = vsyncmov [#allocation3 + $0x1] }
 0x15e   :  { %s488_s2 = vpop.sfrf %487 }
 0x15f   :  { %p607_p5 = scmp.ne.s32.totalorder %s488_s2, 0 }
 0x161   :  { %492 = shalt.err (%p607_p5)  }
 0x162   :  { %494 = vsyncmov [#allocation3 + $0x2] }
 0x165   :  { %s495_s19 = vpop.sfrf %494 }
 0x166   :  { %p608_p6 = scmp.ne.s32.totalorder %s495_s19, 0 }
 0x168   :  { %499 = shalt.err (%p608_p6)  }
 0x169   :  { %501 = vsyncmov [#allocation3 + $0x3] }
 0x16c   :  { %s502_s27 = vpop.sfrf %501 }
 0x16d   :  { %p609_p7 = scmp.ne.s32.totalorder %s502_s27, 0 }
 0x16f   :  { %506 = shalt.err (%p609_p7)  }
 0x170   :  { %508 = vsyncmov [#allocation3 + $0x4] }
 0x173   :  { %s509_s28 = vpop.sfrf %508 }
 0x174   :  { %p610_p8 = scmp.ne.s32.totalorder %s509_s28, 0 }
 0x176   :  { %513 = shalt.err (%p610_p8)  }
 0x177   :  { %515 = vsyncmov [#allocation3 + $0x5] }
 0x17a   :  { %s516_s29 = vpop.sfrf %515 }
 0x17b   :  { %p611_p9 = scmp.ne.s32.totalorder %s516_s29, 0 }
 0x17d   :  { %520 = shalt.err (%p611_p9)  }
 0x17e   :  { %522 = vsyncmov [#allocation3 + $0x6] }
 0x181   :  { %s523_s30 = vpop.sfrf %522 }
 0x182   :  { %p612_p10 = scmp.ne.s32.totalorder %s523_s30, 0 }
 0x184   :  { %527 = shalt.err (%p612_p10)  }
 0x185   :  { %529 = vsyncmov [#allocation3 + $0x7] }
 0x188   :  { %s530_s3 = vpop.sfrf %529 }
 0x189   :  { %p613_p11 = scmp.ne.s32.totalorder %s530_s3, 0 }
 0x18b   :  { %534 = shalt.err (%p613_p11)  }

</bundles_post_ra>
